<compile_context>
chip_gen: v7x
topology: tpu7x:2x2x1
jax: 0.10.0
libtpu: 0.0.40
codegen_flags: <defaults>
</compile_context>

<pallas_src>
import functools
import math

import jax
import jax.numpy as jnp
from jax.experimental import pallas as pl
from jax.experimental.pallas import tpu as pltpu


def _round_up(a, b):
    return (a + b - 1) // b * b


def _choose_tiles(n, d, v, tm=None, tn=None, tk=None):
    # Defaults sized so double-buffered tiles fit comfortably in v7x's 64 MiB
    # VMEM (and therefore also v5e/v6e's 128 MiB), even with f32 inputs.
    if tm is None:
        tm = min(256, _round_up(max(n, 1), 8))
    if tn is None:
        tn = min(1024, _round_up(v, 128))
    if tk is None:
        tk = d if d <= 1024 else 1024
    return tm, tn, tk


# ---------------------------------------------------------------------------
# Kernel 1: tiled projection  scores = x @ W^T + b   (y is None path)
#   grid = (N//TM, V//TN, D//TK), f32 accumulator in VMEM.
# ---------------------------------------------------------------------------
def _proj_kernel(x_ref, w_ref, b_ref, out_ref, acc_ref, *, tk, x_resident):
    k = pl.program_id(2)

    @pl.when(k == 0)
    def _():
        acc_ref[...] = jnp.zeros_like(acc_ref)

    if x_resident:
        # x block holds the full (padded) D slab for this row tile; slice the
        # K-chunk for the current grid step (aligned, compiler-hinted).
        x_blk = x_ref[:, pl.ds(pl.multiple_of(k * tk, tk), tk)]
    else:
        x_blk = x_ref[...]

    # x tile [TM, TK] contracted with W tile [TN, TK] on the last dims.
    acc_ref[...] += jax.lax.dot_general(
        x_blk, w_ref[...],
        dimension_numbers=(((1,), (1,)), ((), ())),
        preferred_element_type=jnp.float32,
    )

    @pl.when(k == pl.num_programs(2) - 1)
    def _():
        out_ref[...] = (acc_ref[...] + b_ref[...].astype(jnp.float32)).astype(
            out_ref.dtype)


# ---------------------------------------------------------------------------
# Kernel 2: tiled projection with fused online cross-entropy.
#   grid = (N//TM, V//TN, D//TK); V and D are reduction ("arbitrary") axes.
#   Per-row online-softmax state (m, l, target-logit) lives in VMEM scratch
#   across the V tiles; per-row NLL is emitted at the last (j, k) step.
# ---------------------------------------------------------------------------
def _proj_ce_kernel(x_ref, w_ref, b_ref, y_ref, scores_ref, nll_ref,
                    acc_ref, m_ref, l_ref, t_ref, *,
                    tk, x_resident, actual_n, actual_v, mask_cols, mask_rows):
    i = pl.program_id(0)          # N tile
    j = pl.program_id(1)          # V tile (CE reduction)
    k = pl.program_id(2)          # D tile (matmul reduction)
    nj = pl.num_programs(1)
    nk = pl.num_programs(2)
    tm, tn = acc_ref.shape

    @pl.when(k == 0)
    def _():
        acc_ref[...] = jnp.zeros_like(acc_ref)

    @pl.when(jnp.logical_and(j == 0, k == 0))
    def _():
        m_ref[...] = jnp.full(m_ref.shape, -jnp.inf, m_ref.dtype)
        l_ref[...] = jnp.zeros(l_ref.shape, l_ref.dtype)
        t_ref[...] = jnp.zeros(t_ref.shape, t_ref.dtype)

    if x_resident:
        x_blk = x_ref[:, pl.ds(pl.multiple_of(k * tk, tk), tk)]
    else:
        x_blk = x_ref[...]

    acc_ref[...] += jax.lax.dot_general(
        x_blk, w_ref[...],
        dimension_numbers=(((1,), (1,)), ((), ())),
        preferred_element_type=jnp.float32,
    )

    @pl.when(k == nk - 1)
    def _():
        logits = acc_ref[...] + b_ref[...].astype(jnp.float32)      # [TM, TN] f32
        scores_ref[...] = logits.astype(scores_ref.dtype)

        # Column ids within the full vocab (lane iota, broadcast over rows).
        col = j * tn + jax.lax.broadcasted_iota(jnp.int32, (1, tn), 1)

        # Mask padded vocab columns before the LSE reduction (trace-time
        # specialized away when V needs no padding).
        if mask_cols:
            masked = jnp.where(col < actual_v, logits, -jnp.inf)
        else:
            masked = logits

        # Online softmax state update over the V tiles.
        m_prev = m_ref[...]
        m_new = jnp.maximum(m_prev, jnp.max(masked, axis=-1, keepdims=True))
        alpha = jnp.exp(m_prev - m_new)
        p = jnp.exp(masked - m_new)
        l_ref[...] = alpha * l_ref[...] + jnp.sum(p, axis=-1, keepdims=True)
        m_ref[...] = m_new

        # Accumulate the target logit (one-hot within this vocab tile).
        hit = col == y_ref[...]
        t_ref[...] += jnp.sum(jnp.where(hit, logits, 0.0), axis=-1, keepdims=True)

        @pl.when(j == nj - 1)
        def _():
            nll = (m_ref[...] + jnp.log(l_ref[...])) - t_ref[...]   # [TM, 1]
            if mask_rows:
                row = i * tm + jax.lax.broadcasted_iota(jnp.int32, (tm, 1), 0)
                nll = jnp.where(row < actual_n, nll, 0.0)
            nll_ref[...] = nll


# ---------------------------------------------------------------------------
# Python wrapper (padding / reshapes are plain JAX glue)
# ---------------------------------------------------------------------------
def xlm_pred_layer(x, weight, bias, y=None, *, tm=None, tn=None, tk=None):
    """x: [..., D]; weight: [V, D]; bias: [V]; y: [...] int labels (optional).

    Returns (scores,) or (loss, scores) like the PyTorch XLMPredLayer.forward.
    """
    lead = x.shape[:-1]
    d = x.shape[-1]
    v = weight.shape[0]
    n = math.prod(lead) if lead else 1

    x_flat = x.reshape(n, d)
    out_dtype = jnp.result_type(x.dtype, weight.dtype)

    tm, tn, tk = _choose_tiles(n, d, v, tm, tn, tk)
    n_pad = _round_up(n, tm)
    v_pad = _round_up(v, tn)
    d_pad = _round_up(d, tk)

    x_p = x_flat
    if (n_pad, d_pad) != (n, d):
        x_p = jnp.pad(x_flat, ((0, n_pad - n), (0, d_pad - d)))
    w_p = weight
    if (v_pad, d_pad) != (v, d):
        w_p = jnp.pad(weight, ((0, v_pad - v), (0, d_pad - d)))
    b_p = bias if v_pad == v else jnp.pad(bias, (0, v_pad - v))
    b_p = b_p.reshape(1, v_pad)

    grid = (n_pad // tm, v_pad // tn, d_pad // tk)

    # Keep the whole (padded) D slab of the x row-tile resident in VMEM when it
    # fits: its block index is then constant across the V and D grid axes, so
    # Pallas issues one DMA per row tile instead of one per (i, j, k) step.
    x_resident = (d_pad > tk) and (tm * d_pad * x_p.dtype.itemsize <= (8 << 20))
    if x_resident:
        x_spec = pl.BlockSpec((tm, d_pad), lambda i, j, k: (i, 0))
    else:
        x_spec = pl.BlockSpec((tm, tk), lambda i, j, k: (i, k))

    flops = 2 * n_pad * d_pad * v_pad
    bytes_accessed = (x_p.size * x_p.dtype.itemsize
                      + w_p.size * w_p.dtype.itemsize
                      + b_p.size * b_p.dtype.itemsize
                      + n_pad * v_pad * jnp.dtype(out_dtype).itemsize)

    if y is None:
        kernel = functools.partial(_proj_kernel, tk=tk, x_resident=x_resident)
        scores_pad = pl.pallas_call(
            kernel,
            out_shape=jax.ShapeDtypeStruct((n_pad, v_pad), out_dtype),
            grid_spec=pltpu.PrefetchScalarGridSpec(
                num_scalar_prefetch=0,
                grid=grid,
                in_specs=[
                    x_spec,
                    pl.BlockSpec((tn, tk), lambda i, j, k: (j, k)),
                    pl.BlockSpec((1, tn), lambda i, j, k: (0, j)),
                ],
                out_specs=pl.BlockSpec((tm, tn), lambda i, j, k: (i, j)),
                scratch_shapes=[pltpu.VMEM((tm, tn), jnp.float32)],
            ),
            compiler_params=pltpu.CompilerParams(
                dimension_semantics=("parallel", "parallel", "arbitrary"),
                vmem_limit_bytes=64 << 20,
            ),
            cost_estimate=pl.CostEstimate(
                flops=flops, transcendentals=0, bytes_accessed=bytes_accessed),
        )(x_p, w_p, b_p)
        scores = scores_pad[:n, :v].reshape(*lead, v)
        return (scores,)

    # Loss path: fused projection + online cross-entropy.
    y_flat = y.reshape(n, 1).astype(jnp.int32)
    y_p = y_flat if n_pad == n else jnp.pad(y_flat, ((0, n_pad - n), (0, 0)))

    kernel = functools.partial(
        _proj_ce_kernel,
        tk=tk, x_resident=x_resident,
        actual_n=n, actual_v=v,
        mask_cols=(v_pad != v), mask_rows=(n_pad != n),
    )
    scores_pad, nll_rows = pl.pallas_call(
        kernel,
        out_shape=(
            jax.ShapeDtypeStruct((n_pad, v_pad), out_dtype),
            jax.ShapeDtypeStruct((n_pad, 1), jnp.float32),
        ),
        grid_spec=pltpu.PrefetchScalarGridSpec(
            num_scalar_prefetch=0,
            grid=grid,
            in_specs=[
                x_spec,
                pl.BlockSpec((tn, tk), lambda i, j, k: (j, k)),
                pl.BlockSpec((1, tn), lambda i, j, k: (0, j)),
                pl.BlockSpec((tm, 1), lambda i, j, k: (i, 0)),
            ],
            out_specs=[
                pl.BlockSpec((tm, tn), lambda i, j, k: (i, j)),
                pl.BlockSpec((tm, 1), lambda i, j, k: (i, 0)),
            ],
            scratch_shapes=[
                pltpu.VMEM((tm, tn), jnp.float32),   # matmul accumulator
                pltpu.VMEM((tm, 1), jnp.float32),    # running max m
                pltpu.VMEM((tm, 1), jnp.float32),    # running sum-exp l
                pltpu.VMEM((tm, 1), jnp.float32),    # target-logit accumulator
            ],
        ),
        compiler_params=pltpu.CompilerParams(
            dimension_semantics=("parallel", "arbitrary", "arbitrary"),
            vmem_limit_bytes=64 << 20,
        ),
        cost_estimate=pl.CostEstimate(
            flops=flops,
            transcendentals=n_pad * v_pad + n_pad,
            bytes_accessed=bytes_accessed + 2 * n_pad * 4),
    )(x_p, w_p, b_p, y_p)

    loss = jnp.sum(nll_rows) / n           # mean over the real rows
    scores = scores_pad[:n, :v].reshape(*lead, v)
    return (loss, scores)


# ---------------------------------------------------------------------------
# Pure-JAX reference + tests
# ---------------------------------------------------------------------------
def _reference(x, weight, bias, y):
    scores = jnp.einsum("...d,vd->...v", x, weight) + bias
    v = weight.shape[0]
    s = scores.reshape(-1, v).astype(jnp.float32)
    logp = jax.nn.log_softmax(s, axis=-1)
    nll = -jnp.take_along_axis(logp, y.reshape(-1, 1), axis=-1)
    return jnp.mean(nll), scores


if __name__ == "__main__":
    # Case A: tiny config consistent with the module (single tile per grid axis,
    # non-resident x path since D fits in one K tile).
    batch, seq, emb_dim, vocab_size, pad_index = 2, 8, 32, 128, 1
    kx, kw, kb, ky = jax.random.split(jax.random.PRNGKey(0), 4)
    x = jax.random.normal(kx, (batch, seq, emb_dim), dtype=jnp.float32)
    weight = jax.random.normal(kw, (vocab_size, emb_dim), dtype=jnp.float32) * 0.05
    bias = jax.random.normal(kb, (vocab_size,), dtype=jnp.float32) * 0.01
    y = jax.random.randint(ky, (batch, seq), 0, vocab_size, dtype=jnp.int32)

    loss, scores = xlm_pred_layer(x, weight, bias, y)
    jax.block_until_ready((loss, scores))
    ref_loss, ref_scores = _reference(x, weight, bias, y)
    assert scores.shape == (batch, seq, vocab_size)
    assert jnp.allclose(scores, ref_scores, atol=1e-3, rtol=1e-3)
    assert jnp.allclose(loss, ref_loss, atol=1e-3, rtol=1e-3)

    # y=None path (scores only), mirroring the optional label in forward().
    (scores_only,) = xlm_pred_layer(x, weight, bias, None)
    jax.block_until_ready(scores_only)
    assert jnp.allclose(scores_only, ref_scores, atol=1e-3, rtol=1e-3)

    # Case B: small shapes but explicit small tiles so the multi-tile grid,
    # K accumulation, resident-x slicing, padded rows, and padded (masked)
    # vocab columns are all exercised.
    batch, seq, emb_dim, vocab_size = 3, 5, 256, 320
    kx, kw, kb, ky = jax.random.split(jax.random.PRNGKey(1), 4)
    x = jax.random.normal(kx, (batch, seq, emb_dim), dtype=jnp.float32)
    weight = jax.random.normal(kw, (vocab_size, emb_dim), dtype=jnp.float32) * 0.05
    bias = jax.random.normal(kb, (vocab_size,), dtype=jnp.float32) * 0.01
    y = jax.random.randint(ky, (batch, seq), 0, vocab_size, dtype=jnp.int32)

    loss, scores = xlm_pred_layer(x, weight, bias, y, tm=8, tn=128, tk=128)
    jax.block_until_ready((loss, scores))
    ref_loss, ref_scores = _reference(x, weight, bias, y)
    assert scores.shape == (batch, seq, vocab_size)
    assert jnp.allclose(scores, ref_scores, atol=1e-3, rtol=1e-3)
    assert jnp.allclose(loss, ref_loss, atol=1e-3, rtol=1e-3)

    (scores_only_b,) = xlm_pred_layer(x, weight, bias, None, tm=8, tn=128, tk=128)
    jax.block_until_ready(scores_only_b)
    assert jnp.allclose(scores_only_b, ref_scores, atol=1e-3, rtol=1e-3)

    print("KERNEL_OK")
</pallas_src>

<mosaic_0001>
module attributes {stable_mosaic.version = 11 : i64} {
  func.func @_proj_ce_kernel(%arg0: i32, %arg1: i32, %arg2: i32, %arg3: memref<16x32xf32, #tpu.memory_space<vmem>>, %arg4: memref<128x32xf32, #tpu.memory_space<vmem>>, %arg5: memref<1x128xf32, #tpu.memory_space<vmem>>, %arg6: memref<16x1xi32, #tpu.memory_space<vmem>>, %arg7: memref<16x128xf32, #tpu.memory_space<vmem>>, %arg8: memref<16x1xf32, #tpu.memory_space<vmem>>, %arg9: memref<16x128xf32, #tpu.memory_space<vmem>>, %arg10: memref<16x1xf32, #tpu.memory_space<vmem>>, %arg11: memref<16x1xf32, #tpu.memory_space<vmem>>, %arg12: memref<16x1xf32, #tpu.memory_space<vmem>>) attributes {dimension_semantics = [#tpu.dimension_semantics<parallel>, #tpu.dimension_semantics<arbitrary>, #tpu.dimension_semantics<arbitrary>], iteration_bounds = array<i64: 1, 1, 1>, scalar_prefetch = 0 : i64, scratch_operands = 4 : i64, tpu.core_type = #tpu.core_type<tc>, window_params = [{transform_indices = @transform_0, window_bounds = array<i64: 16, 32>}, {transform_indices = @transform_1, window_bounds = array<i64: 128, 32>}, {transform_indices = @transform_2, window_bounds = array<i64: 1, 128>}, {transform_indices = @transform_3, window_bounds = array<i64: 16, 1>}, {transform_indices = @transform_4, window_bounds = array<i64: 16, 128>}, {transform_indices = @transform_5, window_bounds = array<i64: 16, 1>}]} {
    %c0_i32 = arith.constant 0 : i32
    %0 = arith.cmpi eq, %arg2, %c0_i32 : i32
    %1 = arith.extui %0 : i1 to i32
    %c0_i32_0 = arith.constant 0 : i32
    %2 = arith.cmpi ne, %1, %c0_i32_0 : i32
    scf.if %2 {
      %cst_13 = arith.constant 0.000000e+00 : f32
      %17 = vector.broadcast %cst_13 : f32 to vector<16x128xf32>
      %c0_14 = arith.constant 0 : index
      %c0_15 = arith.constant 0 : index
      %18 = vector.load %arg9[%c0_14, %c0_15] : memref<16x128xf32, #tpu.memory_space<vmem>>, vector<16x128xf32>
      tpu.vector_store %arg9[%c0_14, %c0_15], %17 {strides = array<i32>} : memref<16x128xf32, #tpu.memory_space<vmem>>, vector<16x128xf32>,
    } else {
    }
    %c0_i32_1 = arith.constant 0 : i32
    %3 = arith.cmpi eq, %arg1, %c0_i32_1 : i32
    %c0_i32_2 = arith.constant 0 : i32
    %4 = arith.cmpi eq, %arg2, %c0_i32_2 : i32
    %5 = arith.andi %3, %4 : i1
    %6 = arith.extui %5 : i1 to i32
    %c0_i32_3 = arith.constant 0 : i32
    %7 = arith.cmpi ne, %6, %c0_i32_3 : i32
    scf.if %7 {
      %cst_13 = arith.constant 0xFF800000 : f32
      %17 = vector.broadcast %cst_13 : f32 to vector<16x1xf32>
      %c0_14 = arith.constant 0 : index
      %c0_15 = arith.constant 0 : index
      %18 = vector.load %arg10[%c0_14, %c0_15] : memref<16x1xf32, #tpu.memory_space<vmem>>, vector<16x1xf32>
      tpu.vector_store %arg10[%c0_14, %c0_15], %17 {strides = array<i32>} : memref<16x1xf32, #tpu.memory_space<vmem>>, vector<16x1xf32>,
      %cst_16 = arith.constant 0.000000e+00 : f32
      %19 = vector.broadcast %cst_16 : f32 to vector<16x1xf32>
      %c0_17 = arith.constant 0 : index
      %c0_18 = arith.constant 0 : index
      %20 = vector.load %arg11[%c0_17, %c0_18] : memref<16x1xf32, #tpu.memory_space<vmem>>, vector<16x1xf32>
      tpu.vector_store %arg11[%c0_17, %c0_18], %19 {strides = array<i32>} : memref<16x1xf32, #tpu.memory_space<vmem>>, vector<16x1xf32>,
      %cst_19 = arith.constant 0.000000e+00 : f32
      %21 = vector.broadcast %cst_19 : f32 to vector<16x1xf32>
      %c0_20 = arith.constant 0 : index
      %c0_21 = arith.constant 0 : index
      %22 = vector.load %arg12[%c0_20, %c0_21] : memref<16x1xf32, #tpu.memory_space<vmem>>, vector<16x1xf32>
      tpu.vector_store %arg12[%c0_20, %c0_21], %21 {strides = array<i32>} : memref<16x1xf32, #tpu.memory_space<vmem>>, vector<16x1xf32>,
    } else {
    }
    %c0 = arith.constant 0 : index
    %c0_4 = arith.constant 0 : index
    %8 = vector.load %arg3[%c0, %c0_4] : memref<16x32xf32, #tpu.memory_space<vmem>>, vector<16x32xf32>
    %c0_5 = arith.constant 0 : index
    %c0_6 = arith.constant 0 : index
    %9 = vector.load %arg9[%c0_5, %c0_6] : memref<16x128xf32, #tpu.memory_space<vmem>>, vector<16x128xf32>
    %c0_7 = arith.constant 0 : index
    %c0_8 = arith.constant 0 : index
    %10 = vector.load %arg4[%c0_7, %c0_8] : memref<128x32xf32, #tpu.memory_space<vmem>>, vector<128x32xf32>
    %cst = arith.constant dense<0.000000e+00> : vector<16x128xf32>
    %11 = tpu.matmul %8, %10, %cst {dimension_numbers = #tpu.dot_dimension_numbers<[1], [1], [0], [0], [0, 0, 1, 0], [], []>} : vector<16x32xf32>, vector<128x32xf32>, vector<16x128xf32> -> vector<16x128xf32>
    %12 = arith.addf %9, %11 : vector<16x128xf32>
    %c0_9 = arith.constant 0 : index
    %c0_10 = arith.constant 0 : index
    %13 = vector.load %arg9[%c0_9, %c0_10] : memref<16x128xf32, #tpu.memory_space<vmem>>, vector<16x128xf32>
    tpu.vector_store %arg9[%c0_9, %c0_10], %12 {strides = array<i32>} : memref<16x128xf32, #tpu.memory_space<vmem>>, vector<16x128xf32>,
    %c0_i32_11 = arith.constant 0 : i32
    %14 = arith.cmpi eq, %arg2, %c0_i32_11 : i32
    %15 = arith.extui %14 : i1 to i32
    %c0_i32_12 = arith.constant 0 : i32
    %16 = arith.cmpi ne, %15, %c0_i32_12 : i32
    scf.if %16 {
      %c0_13 = arith.constant 0 : index
      %c0_14 = arith.constant 0 : index
      %17 = vector.load %arg9[%c0_13, %c0_14] : memref<16x128xf32, #tpu.memory_space<vmem>>, vector<16x128xf32>
      %c0_15 = arith.constant 0 : index
      %c0_16 = arith.constant 0 : index
      %18 = vector.load %arg5[%c0_15, %c0_16] : memref<1x128xf32, #tpu.memory_space<vmem>>, vector<1x128xf32>
      %19 = vector.broadcast %18 : vector<1x128xf32> to vector<16x128xf32>
      %20 = arith.addf %17, %19 : vector<16x128xf32>
      %c0_17 = arith.constant 0 : index
      %c0_18 = arith.constant 0 : index
      %21 = vector.load %arg7[%c0_17, %c0_18] : memref<16x128xf32, #tpu.memory_space<vmem>>, vector<16x128xf32>
      tpu.vector_store %arg7[%c0_17, %c0_18], %20 {strides = array<i32>} : memref<16x128xf32, #tpu.memory_space<vmem>>, vector<16x128xf32>,
      %c128_i32 = arith.constant 128 : i32
      %22 = arith.muli %arg1, %c128_i32 : i32
      %23 = tpu.iota {dimensions = array<i32: 1>} : vector<1x128xi32>
      %24 = vector.broadcast %22 : i32 to vector<1x128xi32>
      %25 = arith.addi %24, %23 : vector<1x128xi32>
      %c0_19 = arith.constant 0 : index
      %c0_20 = arith.constant 0 : index
      %26 = vector.load %arg10[%c0_19, %c0_20] : memref<16x1xf32, #tpu.memory_space<vmem>>, vector<16x1xf32>
      %cst_21 = arith.constant dense<0xFF800000> : vector<16xf32>
      %27 = vector.multi_reduction <maximumf>, %20, %cst_21 [1] : vector<16x128xf32> to vector<16xf32>
      %28 = vector.shape_cast %27 : vector<16xf32> to vector<16x1xf32>
      %29 = arith.maximumf %26, %28 : vector<16x1xf32>
      %30 = arith.subf %26, %29 : vector<16x1xf32>
      %31 = math.exp %30 : vector<16x1xf32>
      %32 = vector.broadcast %29 : vector<16x1xf32> to vector<16x128xf32>
      %33 = arith.subf %20, %32 : vector<16x128xf32>
      %34 = math.exp %33 : vector<16x128xf32>
      %c0_22 = arith.constant 0 : index
      %c0_23 = arith.constant 0 : index
      %35 = vector.load %arg11[%c0_22, %c0_23] : memref<16x1xf32, #tpu.memory_space<vmem>>, vector<16x1xf32>
      %36 = arith.mulf %31, %35 : vector<16x1xf32>
      %cst_24 = arith.constant dense<0.000000e+00> : vector<16xf32>
      %37 = vector.multi_reduction <add>, %34, %cst_24 [1] : vector<16x128xf32> to vector<16xf32>
      %38 = vector.shape_cast %37 : vector<16xf32> to vector<16x1xf32>
      %39 = arith.addf %36, %38 : vector<16x1xf32>
      %c0_25 = arith.constant 0 : index
      %c0_26 = arith.constant 0 : index
      %40 = vector.load %arg11[%c0_25, %c0_26] : memref<16x1xf32, #tpu.memory_space<vmem>>, vector<16x1xf32>
      tpu.vector_store %arg11[%c0_25, %c0_26], %39 {strides = array<i32>} : memref<16x1xf32, #tpu.memory_space<vmem>>, vector<16x1xf32>,
      %c0_27 = arith.constant 0 : index
      %c0_28 = arith.constant 0 : index
      %41 = vector.load %arg10[%c0_27, %c0_28] : memref<16x1xf32, #tpu.memory_space<vmem>>, vector<16x1xf32>
      tpu.vector_store %arg10[%c0_27, %c0_28], %29 {strides = array<i32>} : memref<16x1xf32, #tpu.memory_space<vmem>>, vector<16x1xf32>,
      %c0_29 = arith.constant 0 : index
      %c0_30 = arith.constant 0 : index
      %42 = vector.load %arg6[%c0_29, %c0_30] : memref<16x1xi32, #tpu.memory_space<vmem>>, vector<16x1xi32>
      %43 = vector.broadcast %25 : vector<1x128xi32> to vector<16x128xi32>
      %44 = vector.broadcast %42 : vector<16x1xi32> to vector<16x128xi32>
      %45 = arith.cmpi eq, %43, %44 : vector<16x128xi32>
      %c0_31 = arith.constant 0 : index
      %c0_32 = arith.constant 0 : index
      %46 = vector.load %arg12[%c0_31, %c0_32] : memref<16x1xf32, #tpu.memory_space<vmem>>, vector<16x1xf32>
      %cst_33 = arith.constant 0.000000e+00 : f32
      %47 = vector.broadcast %cst_33 : f32 to vector<16x128xf32>
      %48 = arith.select %45, %20, %47 : vector<16x128xi1>, vector<16x128xf32>
      %cst_34 = arith.constant dense<0.000000e+00> : vector<16xf32>
      %49 = vector.multi_reduction <add>, %48, %cst_34 [1] : vector<16x128xf32> to vector<16xf32>
      %50 = vector.shape_cast %49 : vector<16xf32> to vector<16x1xf32>
      %51 = arith.addf %46, %50 : vector<16x1xf32>
      %c0_35 = arith.constant 0 : index
      %c0_36 = arith.constant 0 : index
      %52 = vector.load %arg12[%c0_35, %c0_36] : memref<16x1xf32, #tpu.memory_space<vmem>>, vector<16x1xf32>
      tpu.vector_store %arg12[%c0_35, %c0_36], %51 {strides = array<i32>} : memref<16x1xf32, #tpu.memory_space<vmem>>, vector<16x1xf32>,
      %c0_i32_37 = arith.constant 0 : i32
      %53 = arith.cmpi eq, %arg1, %c0_i32_37 : i32
      %54 = arith.extui %53 : i1 to i32
      %c0_i32_38 = arith.constant 0 : i32
      %55 = arith.cmpi ne, %54, %c0_i32_38 : i32
      scf.if %55 {
        %c0_39 = arith.constant 0 : index
        %c0_40 = arith.constant 0 : index
        %56 = vector.load %arg10[%c0_39, %c0_40] : memref<16x1xf32, #tpu.memory_space<vmem>>, vector<16x1xf32>
        %c0_41 = arith.constant 0 : index
        %c0_42 = arith.constant 0 : index
        %57 = vector.load %arg11[%c0_41, %c0_42] : memref<16x1xf32, #tpu.memory_space<vmem>>, vector<16x1xf32>
        %58 = math.log %57 : vector<16x1xf32>
        %59 = arith.addf %56, %58 : vector<16x1xf32>
        %c0_43 = arith.constant 0 : index
        %c0_44 = arith.constant 0 : index
        %60 = vector.load %arg12[%c0_43, %c0_44] : memref<16x1xf32, #tpu.memory_space<vmem>>, vector<16x1xf32>
        %61 = arith.subf %59, %60 : vector<16x1xf32>
        %c0_45 = arith.constant 0 : index
        %c0_46 = arith.constant 0 : index
        %62 = vector.load %arg8[%c0_45, %c0_46] : memref<16x1xf32, #tpu.memory_space<vmem>>, vector<16x1xf32>
        tpu.vector_store %arg8[%c0_45, %c0_46], %61 {strides = array<i32>} : memref<16x1xf32, #tpu.memory_space<vmem>>, vector<16x1xf32>,
      } else {
      }
    } else {
    }
    return
  }
  func.func @transform_0(%arg0: i32, %arg1: i32, %arg2: i32) -> (i32, i32) {
    %c0_i32 = arith.constant 0 : i32
    return %arg0, %arg2 : i32, i32
  }
  func.func @transform_1(%arg0: i32, %arg1: i32, %arg2: i32) -> (i32, i32) {
    %c0_i32 = arith.constant 0 : i32
    return %arg1, %arg2 : i32, i32
  }
  func.func @transform_2(%arg0: i32, %arg1: i32, %arg2: i32) -> (i32, i32) {
    %c0_i32 = arith.constant 0 : i32
    %c0_i32_0 = arith.constant 0 : i32
    return %c0_i32, %arg1 : i32, i32
  }
  func.func @transform_3(%arg0: i32, %arg1: i32, %arg2: i32) -> (i32, i32) {
    %c0_i32 = arith.constant 0 : i32
    %c0_i32_0 = arith.constant 0 : i32
    return %arg0, %c0_i32 : i32, i32
  }
  func.func @transform_4(%arg0: i32, %arg1: i32, %arg2: i32) -> (i32, i32) {
    %c0_i32 = arith.constant 0 : i32
    return %arg0, %arg1 : i32, i32
  }
  func.func @transform_5(%arg0: i32, %arg1: i32, %arg2: i32) -> (i32, i32) {
    %c0_i32 = arith.constant 0 : i32
    %c0_i32_0 = arith.constant 0 : i32
    return %arg0, %c0_i32 : i32, i32
  }
}

</mosaic_0001>

<bundles_post_ra>
// kernel: tpu_custom_call.1
= control target key start
LH: loop header
LB: loop body
LE: loop exit
PB: predicated region body
PF: predicated region fallthrough
CT: control target
= control target key end

     0   :  { %11 = vsyncpa [#allocation7], 0  ;;  %s871_s0 = inlined_call_operand.hbm [shape: f32[16,32], index: 0, kind: input, shape index: {}]   ;;  %s872_s1 = inlined_call_operand.hbm [shape: f32[128,32], index: 1, kind: input, shape index: {}]   ;;  %s873_s2 = inlined_call_operand.hbm [shape: f32[1,128], index: 2, kind: input, shape index: {}]   ;;  %s874_s3 = inlined_call_operand.hbm [shape: s32[16,1], index: 3, kind: input, shape index: {}]   ;;  %s875_s4 = inlined_call_operand.hbm [shape: f32[16,128], index: 4, kind: output, shape index: {0}]   ;;  %s876_s5 = inlined_call_operand.hbm [shape: f32[16,1], index: 5, kind: output, shape index: {1}]  }
   0x1   :  { %12 = vsyncpa [#allocation10], 0 }
   0x2   :  { %13 = vsyncpa [#allocation13], 0 }
   0x3   :  { %14 = vsyncpa [#allocation8], 0 }
   0x4   :  { %15 = vsyncpa [#allocation16], 0  ;;  %s675_s18 = smov [#allocation9]   ;;  %s676_s20 = smov [#allocation6]  }
   0x5   :  { %s33_s19 = sshll.u32 %s675_s18, 4  ;;  %s21_s21 = sshll.u32 %s676_s20, 4  ;;  %s34_s19 = int_to_ptr.vmem [resolvable:$true] %s33_s19  ;;  %s716_s21 = int_to_ptr.vmem [resolvable:$true] %s21_s21 }
   0x6   :  { %s533_s24 = scalar_lea.hbm %s872_s1, 2048 }
   0x7   :  { %p534_p0 = scmp.ne.s32.totalorder %s872_s1, %s533_s24  ;;  %p537_p1 = scmp.lt.u32.totalorder %s533_s24, %s872_s1 }
   0x9   :  { %p539_p2 = pnand %p537_p1, %p534_p0 }
   0xb   :  { %542 = shalt.err (!%p539_p2)
}
   0xc   :  { %s543_s29 = scalar_lea.vmem %s34_s19, 2048  ;;  %p548_p4 = scmp.lt.s32.totalorder %s34_s19, %s34_s19 }
   0xd   :  { %p544_p3 = scmp.ne.s32.totalorder %s34_s19, %s543_s29  ;;  %p549_p5 = scmp.lt.s32.totalorder %s543_s29, %s543_s29 }
   0xf   :  { %p550_p6 = por %p549_p5, %p548_p4 }
  0x11   :  { %p551_p7 = pnand %p550_p6, %p544_p3 }
  0x13   :  { %554 = shalt.err (!%p551_p7)
}
  0x14   :  { %s677_s30 = smov 128   ;;  %s678_s6 = smov 8  }
  0x15   :  { %39 = dma.hbm_to_vmem [thread:$0]  %s872_s1, 2048, %s34_s19, [#allocation10], %s677_s30, %s677_s30, %s678_s6  }
  0x16   :  { %s555_s11 = scalar_lea.hbm %s871_s0, 256 }
  0x17   :  { %p556_p8 = scmp.ne.s32.totalorder %s871_s0, %s555_s11  ;;  %p559_p9 = scmp.lt.u32.totalorder %s555_s11, %s871_s0 }
  0x19   :  { %p561_p10 = pnand %p559_p9, %p556_p8 }
  0x1b   :  { %564 = shalt.err (!%p561_p10)
}
  0x1c   :  { %s565_s16 = scalar_lea.vmem %s716_s21, 256  ;;  %p570_p12 = scmp.lt.s32.totalorder %s716_s21, %s716_s21 }
  0x1d   :  { %p566_p11 = scmp.ne.s32.totalorder %s716_s21, %s565_s16  ;;  %p571_p13 = scmp.lt.s32.totalorder %s565_s16, %s565_s16 }
  0x1f   :  { %p572_p0 = por %p571_p13, %p570_p12 }
  0x21   :  { %p573_p1 = pnand %p572_p0, %p566_p11 }
  0x23   :  { %576 = shalt.err (!%p573_p1)
}
  0x24   :  { %27 = dma.hbm_to_vmem [thread:$0]  %s871_s0, 256, %s716_s21, [#allocation7], %s677_s30, %s677_s30, %s678_s6  }
  0x25   :  { %s679_s18 = smov [#allocation11]   ;;  %s680_s20 = smov [#allocation12]  }
  0x26   :  { %s46_s19 = sshll.u32 %s679_s18, 4  ;;  %s55_s22 = sshll.u32 %s680_s20, 4  ;;  %s47_s19 = int_to_ptr.vmem [resolvable:$true] %s46_s19  ;;  %s753_s22 = int_to_ptr.vmem [resolvable:$true] %s55_s22 }
  0x27   :  { %s577_s25 = scalar_lea.hbm %s873_s2, 16 }
  0x28   :  { %p578_p2 = scmp.ne.s32.totalorder %s873_s2, %s577_s25  ;;  %p581_p3 = scmp.lt.u32.totalorder %s577_s25, %s873_s2 }
  0x2a   :  { %p583_p4 = pnand %p581_p3, %p578_p2 }
  0x2c   :  { %586 = shalt.err (!%p583_p4)
}
  0x2d   :  { %s587_s0 = scalar_lea.vmem %s47_s19, 16  ;;  %s591_s21 = scalar_lea.vmem %s47_s19, 32 }
  0x2e   :  { %p588_p5 = scmp.ne.s32.totalorder %s47_s19, %s587_s0  ;;  %p592_p6 = scmp.lt.s32.totalorder %s47_s19, %s47_s19 }
  0x2f   :  { %p593_p7 = scmp.lt.s32.totalorder %s591_s21, %s587_s0 }
  0x31   :  { %p594_p8 = por %p593_p7, %p592_p6 }
  0x33   :  { %p595_p9 = pnand %p594_p8, %p588_p5 }
  0x35   :  { %598 = shalt.err (!%p595_p9)
}
  0x36   :  { %49 = dma.hbm_to_vmem [thread:$0]  %s873_s2, 16, %s47_s19, [#allocation10]  }
  0x37   :  { %s599_s11 = scalar_lea.hbm %s874_s3, 256 }
  0x38   :  { %p600_p10 = scmp.ne.s32.totalorder %s874_s3, %s599_s11  ;;  %p603_p11 = scmp.lt.u32.totalorder %s599_s11, %s874_s3 }
  0x3a   :  { %p605_p12 = pnand %p603_p11, %p600_p10 }
  0x3c   :  { %608 = shalt.err (!%p605_p12)
}
  0x3d   :  { %s609_s16 = scalar_lea.vmem %s753_s22, 256  ;;  %p614_p0 = scmp.lt.s32.totalorder %s753_s22, %s753_s22 }
  0x3e   :  { %p610_p13 = scmp.ne.s32.totalorder %s753_s22, %s609_s16  ;;  %p615_p1 = scmp.lt.s32.totalorder %s609_s16, %s609_s16 }
  0x40   :  { %p616_p2 = por %p615_p1, %p614_p0 }
  0x42   :  { %p617_p3 = pnand %p616_p2, %p610_p13 }
  0x44   :  { %620 = shalt.err (!%p617_p3)
}
  0x45   :  { %61 = dma.hbm_to_vmem [thread:$0]  %s874_s3, 256, %s753_s22, [#allocation13], %s677_s30, %s677_s30, %s678_s6  }
  0x46   :  { %665 = dma.done.wait [#allocation7], 256  }
  0x47   :  { %666 = vsyncadd [#allocation7], 4294967040 }
  0x48   :  { %667 = dma.done.wait [#allocation10], 2064  }
  0x49   :  { %668 = vsyncadd [#allocation10], 4294965232 }
  0x4a   :  { %669 = dma.done.wait [#allocation13], 256  }
  0x4b   :  { %670 = vsyncadd [#allocation13], 4294967040  ;;  %vm112_vm0 = vcmask 261120   ;;  %v96_v1 = vld [vmem:[#allocation9] sm:$0xff]  ;;  %v97_v2 = vld [vmem:[#allocation9 + $0x8] sm:$0xff]  ;;  %v681_v27 = vmov 0   ;;  %v263_v43 = vlaneseq }
  0x4c   :  { %vm789_vm1 = vmpackc.low %vm112_vm0, %vm112_vm0  ;;  %v98_v3 = vld [vmem:[#allocation9 + $0x10] sm:$0xff]  ;;  %v460_v4 = vpack.c.bf16 %v97_v2, %v96_v1  ;;  %v99_v5 = vld [vmem:[#allocation9 + $0x18] sm:$0xff]  ;;  %520 = vset.pattern.permute.xlu0 %v681_v27  ;;  %519 = vset.pattern.permute.xlu1 %v681_v27  ;;  %vm85_vm2 = vcmask 7168   ;;  %v682_v28 = vmov -inf   ;;  %v683_v35 = vmov 0.0   ;;  %s684_s3 = smov [#allocation14]  }
  0x4d   :  { %v466_v6 = vpack.c.bf16 %v99_v5, %v98_v3  ;;  %v92_v7 = vld [vmem:[#allocation6] sm:$0xff]  ;;  %v100_v8 = vld [vmem:[#allocation9 + $0x20] sm:$0xff]  ;;  %v101_v9 = vld [vmem:[#allocation9 + $0x28] sm:$0xff]  ;;  %86 = vst.msk [vmem:[#allocation3] sm:$0xff] %vm85_vm2, %v682_v28  ;;  %v264_v46 = vand.u32 127, %v263_v43  ;;  %s358_s17 = sshll.u32 %s684_s3, 4  ;;  %s359_s17 = int_to_ptr.vmem [resolvable:$true] %s358_s17 }
  0x4e   :  { %462 = vmatprep.subr.msk.bf16.mxu0 %vm789_vm1, %v460_v4  ;;  %457 = vmatprep.mubr.msk.f32.mxu0 %vm112_vm0, %v92_v7  ;;  %v472_v10 = vpack.c.bf16 %v101_v9, %v100_v8  ;;  %v102_v11 = vld [vmem:[#allocation9 + $0x30] sm:$0xff]  ;;  %v103_v12 = vld [vmem:[#allocation9 + $0x38] sm:$0xff]  ;;  %v104_v14 = vld [vmem:[#allocation9 + $0x40] sm:$0xff]  ;;  %87 = vst.msk [vmem:[#allocation3 + $0x8] sm:$0xff] %vm85_vm2, %v682_v28  ;;  %s621_s18 = scalar_lea.vmem %s359_s17, 256  ;;  %p626_p5 = scmp.lt.s32.totalorder %s359_s17, %s359_s17 }
  0x4f   :  { %465 = vmatpush3.bf16.xpose.msk.msra.mxu0 %vm789_vm1, %v460_v4  ;;  %v478_v13 = vpack.c.bf16 %v103_v12, %v102_v11  ;;  %v105_v15 = vld [vmem:[#allocation9 + $0x48] sm:$0xff]  ;;  %v106_v17 = vld [vmem:[#allocation9 + $0x50] sm:$0xff]  ;;  %v107_v18 = vld [vmem:[#allocation9 + $0x58] sm:$0xff]  ;;  %90 = vst.msk [vmem:[#allocation5] sm:$0xff] %vm85_vm2, %v683_v35  ;;  %p622_p4 = scmp.ne.s32.totalorder %s359_s17, %s621_s18  ;;  %p627_p6 = scmp.lt.s32.totalorder %s621_s18, %s621_s18 }
  0x50   :  { %468 = vmatprep.subr.msk.bf16.mxu0 %vm789_vm1, %v466_v6  ;;  %v484_v16 = vpack.c.bf16 %v105_v15, %v104_v14  ;;  %v490_v19 = vpack.c.bf16 %v107_v18, %v106_v17  ;;  %v108_v20 = vld [vmem:[#allocation9 + $0x60] sm:$0xff]  ;;  %v109_v21 = vld [vmem:[#allocation9 + $0x68] sm:$0xff]  ;;  %v110_v23 = vld [vmem:[#allocation9 + $0x70] sm:$0xff]  ;;  %88 = vst.msk [vmem:[#allocation4] sm:$0xff] %vm85_vm2, %v683_v35 }
  0x51   :  { %v496_v22 = vpack.c.bf16 %v109_v21, %v108_v20  ;;  %v111_v24 = vld [vmem:[#allocation9 + $0x78] sm:$0xff]  ;;  %v406_v29 = vld [vmem:[#allocation11] ss:$0 sm:$0xff]  ;;  %v312_v34 = vld [vmem:[#allocation12] sm:$0xff]  ;;  %89 = vst.msk [vmem:[#allocation4 + $0x8] sm:$0xff] %vm85_vm2, %v683_v35  ;;  %p628_p7 = por %p627_p6, %p626_p5 }
  0x52   :  { %v502_v25 = vpack.c.bf16 %v111_v24, %v110_v23  ;;  %v93_v26 = vld [vmem:[#allocation6 + $0x8] sm:$0xff]  ;;  %91 = vst.msk [vmem:[#allocation5 + $0x8] sm:$0xff] %vm85_vm2, %v683_v35  ;;  %v313_v45 = vld [vmem:[#allocation12 + $0x8] sm:$0xff] }
  0x53   :  { %p629_p8 = pnand %p628_p7, %p622_p4 }
  0x54   :  { %v267_v36 = vld [vmem:[#allocation3] sm:$0xff] }
  0x55   :  { %v268_v39 = vld [vmem:[#allocation3 + $0x8] sm:$0xff] }
  0x56   :  { %v322_v59 = vld [vmem:[#allocation5] sm:$0xff] }
  0x57   :  { %471 = vmatpush3.bf16.xpose.msk.msra.mxu0 %vm789_vm1, %v466_v6 }
  0x58   :  { %474 = vmatprep.subr.msk.bf16.mxu0 %vm789_vm1, %v472_v10 }
  0x5f   :  { %477 = vmatpush3.bf16.xpose.msk.msra.mxu0 %vm789_vm1, %v472_v10 }
  0x60   :  { %480 = vmatprep.subr.msk.bf16.mxu0 %vm789_vm1, %v478_v13 }
  0x67   :  { %483 = vmatpush3.bf16.xpose.msk.msra.mxu0 %vm789_vm1, %v478_v13 }
  0x68   :  { %486 = vmatprep.subr.msk.bf16.mxu0 %vm789_vm1, %v484_v16 }
  0x6f   :  { %489 = vmatpush3.bf16.xpose.msk.msra.mxu0 %vm789_vm1, %v484_v16 }
  0x70   :  { %492 = vmatprep.subr.msk.bf16.mxu0 %vm789_vm1, %v490_v19 }
  0x77   :  { %495 = vmatpush3.bf16.xpose.msk.msra.mxu0 %vm789_vm1, %v490_v19 }
  0x78   :  { %498 = vmatprep.subr.msk.bf16.mxu0 %vm789_vm1, %v496_v22 }
  0x7f   :  { %501 = vmatpush3.bf16.xpose.msk.msra.mxu0 %vm789_vm1, %v496_v22 }
  0x80   :  { %504 = vmatprep.subr.msk.bf16.mxu0 %vm789_vm1, %v502_v25 }
  0x87   :  { %507 = vmatpush3.bf16.xpose.msk.msra.mxu0 %vm789_vm1, %v502_v25 }
  0x8e   :  { %458 = vmatmul.mubr.msk.f32.vlgmr.msra.gmra.mrb[0].mxu0 %vm112_vm0, %v93_v26 }
 0x161   :  { %v459_v30 = vpop.f32.mrb[0].mxu0 }
 0x162   :  { %v259_v31 = vadd.f32 %v459_v30, %v406_v29  ;;  %v233_v32 = vpop.f32.mrb[1].mxu0 }
 0x163   :  { %v258_v33 = vadd.f32 %v406_v29, %v233_v32 }
 0x164   :  { %261 = vst [vmem:[#allocation14 + $0x8] sm:$0xff] %v259_v31 }
 0x165   :  { %260 = vst [vmem:[#allocation14] sm:$0xff] %v258_v33  ;;  %269 = vmax.xlane.f32.xlu0 %v258_v33 }
 0x169   :  { %271 = vmax.xlane.f32.xlu0 %v259_v31 }
 0x17f   :  { %315 = vperm.xlu0 %520, %v312_v34  }
 0x1f2   :  { %v270_v37 = vpop.xlane.xlu0 %269 }
 0x1f3   :  { %v273_v38 = vmax.f32 %v267_v36, %v270_v37 }
 0x1f5   :  { %v275_v40 = vsub.f32 %v267_v36, %v273_v38  ;;  %310 = vst.msk [vmem:[#allocation3] sm:$0xff] %vm85_vm2, %v273_v38  ;;  %283 = vperm.xlu1 %519, %v273_v38  }
 0x1f6   :  { %v272_v41 = vpop.xlane.xlu0 %271 }
 0x1f7   :  { %v274_v42 = vmax.f32 %v268_v39, %v272_v41 }
 0x1f9   :  { %v276_v44 = vsub.f32 %v268_v39, %v274_v42  ;;  %311 = vst.msk [vmem:[#allocation3 + $0x8] sm:$0xff] %vm85_vm2, %v274_v42  ;;  %288 = vperm.xlu1 %519, %v274_v42  }
 0x1fd   :  { %318 = vperm.xlu1 %519, %v313_v45  }
 0x1fe   :  { %v316_v47 = vpop.permute.xlu0 %315 }
 0x1ff   :  { %vm320_vm3 = vcmp.eq.s32.totalorder %v264_v46, %v316_v47 }
 0x200   :  { %v324_v48 = vsel %vm320_vm3, %v258_v33, 0.0 }
 0x201   :  { %326 = vadd.xlane.f32.xlu0 %v324_v48 }
 0x274   :  { %v284_v49 = vpop.permute.xlu1 %283 }
 0x275   :  { %v291_v50 = vsub.f32 %v258_v33, %v284_v49 }
 0x277   :  { %v293_v51 = vmul.f32 1.442695, %v291_v50 }
 0x278   :  { %v289_v52 = vpop.permute.xlu1 %288 }
 0x279   :  { %521 = vpow2.f32 %v293_v51  ;;  %v292_v53 = vsub.f32 %v259_v31, %v289_v52 }
 0x27b   :  { %v295_v54 = vmul.f32 1.442695, %v292_v53 }
 0x27c   :  { %v319_v56 = vpop.permute.xlu1 %318 }
 0x27d   :  { %523 = vpow2.f32 %v295_v54  ;;  %vm321_vm4 = vcmp.eq.s32.totalorder %v264_v46, %v319_v56 }
 0x27e   :  { %v325_v58 = vsel %vm321_vm4, %v259_v31, 0.0 }
 0x283   :  { %v522_v55 = vpop.eup %521 }
 0x284   :  { %301 = vadd.xlane.f32.xlu1 %v522_v55 }
 0x287   :  { %v524_v57 = vpop.eup %523 }
 0x288   :  { %303 = vadd.xlane.f32.xlu1 %v524_v57 }
 0x28c   :  { %328 = vadd.xlane.f32.xlu1 %v325_v58 }
 0x28e   :  { %v327_v60 = vpop.xlane.xlu0 %326 }
 0x28f   :  { %v330_v61 = vadd.f32 %v327_v60, %v322_v59 }
 0x291   :  { %332 = vst.msk [vmem:[#allocation5] sm:$0xff] %vm85_vm2, %v330_v61 }
 0x292   :  { %632 = shalt.err (!%p629_p8)
}
 0x293   :  { %s633_s22 = scalar_lea.hbm %s875_s4, 256 }
 0x294   :  { %p634_p9 = scmp.ne.s32.totalorder %s875_s4, %s633_s22  ;;  %p637_p10 = scmp.lt.u32.totalorder %s633_s22, %s875_s4 }
 0x296   :  { %p639_p11 = pnand %p637_p10, %p634_p9 }
 0x298   :  { %642 = shalt.err (!%p639_p11)
}
 0x299   :  { %364 = dma.vmem_to_hbm [thread:$0]  %s359_s17, 256, %s875_s4, [#allocation8], %s677_s30, %s677_s30, %s678_s6   ;;  %v277_v62 = vmul.f32 1.442695, %v275_v40  ;;  %v279_v63 = vmul.f32 1.442695, %v276_v44 }
 0x29a   :  { %v297_v1 = vld [vmem:[#allocation4] sm:$0xff]  ;;  %v298_v5 = vld [vmem:[#allocation4 + $0x8] sm:$0xff]  ;;  %v323_v10 = vld [vmem:[#allocation5 + $0x8] sm:$0xff]  ;;  %s685_s4 = smov [#allocation15]  }
 0x29b   :  { %525 = vpow2.f32 %v277_v62  ;;  %v337_v17 = vld [vmem:[#allocation3] sm:$0xff]  ;;  %v338_v23 = vld [vmem:[#allocation3 + $0x8] sm:$0xff]  ;;  %s370_s29 = sshll.u32 %s685_s4, 4  ;;  %s371_s29 = int_to_ptr.vmem [resolvable:$true] %s370_s29 }
 0x29c   :  { %527 = vpow2.f32 %v279_v63  ;;  %v347_v20 = vld [vmem:[#allocation5] sm:$0xff]  ;;  %s643_s0 = scalar_lea.vmem %s371_s29, 256  ;;  %p648_p13 = scmp.lt.s32.totalorder %s371_s29, %s371_s29 }
 0x29d   :  { %p644_p12 = scmp.ne.s32.totalorder %s371_s29, %s643_s0  ;;  %p649_p0 = scmp.lt.s32.totalorder %s643_s0, %s643_s0 }
 0x29f   :  { %p650_p1 = por %p649_p0, %p648_p13 }
 0x2a1   :  { %p651_p2 = pnand %p650_p1, %p644_p12 }
 0x2a5   :  { %v526_v0 = vpop.eup %525 }
 0x2a6   :  { %v299_v2 = vmul.f32 %v526_v0, %v297_v1  ;;  %v528_v3 = vpop.eup %527 }
 0x2a7   :  { %v300_v7 = vmul.f32 %v528_v3, %v298_v5 }
 0x311   :  { %v302_v4 = vpop.xlane.xlu1 %301 }
 0x312   :  { %v305_v6 = vadd.f32 %v302_v4, %v299_v2 }
 0x314   :  { %308 = vst.msk [vmem:[#allocation4] sm:$0xff] %vm85_vm2, %v305_v6 }
 0x315   :  { %v304_v8 = vpop.xlane.xlu1 %303 }
 0x316   :  { %v306_v9 = vadd.f32 %v304_v8, %v300_v7 }
 0x318   :  { %309 = vst.msk [vmem:[#allocation4 + $0x8] sm:$0xff] %vm85_vm2, %v306_v9 }
 0x319   :  { %v329_v11 = vpop.xlane.xlu1 %328 }
 0x31a   :  { %v331_v12 = vadd.f32 %v329_v11, %v323_v10 }
 0x31b   :  { %v339_v13 = vld [vmem:[#allocation4] sm:$0xff] }
 0x31c   :  { %333 = vst.msk [vmem:[#allocation5 + $0x8] sm:$0xff] %vm85_vm2, %v331_v12  ;;  %529 = vlog2.f32 %v339_v13 }
 0x31f   :  { %v340_v14 = vld [vmem:[#allocation4 + $0x8] sm:$0xff] }
 0x320   :  { %531 = vlog2.f32 %v340_v14 }
 0x323   :  { %v348_v25 = vld [vmem:[#allocation5 + $0x8] sm:$0xff] }
 0x326   :  { %v530_v15 = vpop.eup %529 }
 0x327   :  { %v342_v16 = vmul.f32 0.6931472, %v530_v15 }
 0x329   :  { %v345_v18 = vadd.f32 %v342_v16, %v337_v17 }
 0x32a   :  { %v532_v19 = vpop.eup %531 }
 0x32b   :  { %v344_v21 = vmul.f32 0.6931472, %v532_v19  ;;  %v349_v22 = vsub.f32 %v345_v18, %v347_v20 }
 0x32d   :  { %v346_v24 = vadd.f32 %v344_v21, %v338_v23  ;;  %351 = vst.msk [vmem:[#allocation15] sm:$0xff] %vm85_vm2, %v349_v22 }
 0x32f   :  { %v350_v26 = vsub.f32 %v346_v24, %v348_v25 }
 0x331   :  { %352 = vst.msk [vmem:[#allocation15 + $0x8] sm:$0xff] %vm85_vm2, %v350_v26 }
 0x332   :  { %654 = shalt.err (!%p651_p2)
}
 0x333   :  { %s655_s8 = scalar_lea.hbm %s876_s5, 256 }
 0x334   :  { %p656_p3 = scmp.ne.s32.totalorder %s876_s5, %s655_s8  ;;  %p659_p4 = scmp.lt.u32.totalorder %s655_s8, %s876_s5 }
 0x336   :  { %p661_p5 = pnand %p659_p4, %p656_p3 }
 0x338   :  { %664 = shalt.err (!%p661_p5)
}
 0x339   :  { %376 = dma.vmem_to_hbm [thread:$0]  %s371_s29, 256, %s876_s5, [#allocation16], %s677_s30, %s677_s30, %s678_s6  }
 0x33a   :  { %671 = dma.done.wait [#allocation8], 256  }
 0x33b   :  { %672 = vsyncadd [#allocation8], 4294967040 }
 0x33c   :  { %673 = dma.done.wait [#allocation16], 256  }
 0x33d   :  { %674 = vsyncadd [#allocation16], 4294967040 }
 0x33e   :  { %383 = vsyncpa [#allocation7], 1 }
 0x33f   :  { %384 = vsyncpa [#allocation10], 1 }
 0x340   :  { %385 = vsyncpa [#allocation13], 1 }
 0x341   :  { %386 = vsyncpa [#allocation8], 1 }
 0x342   :  { %387 = vsyncpa [#allocation16], 1 }

</bundles_post_ra>
